<compile_context>
chip_gen: v7x
topology: tpu7x:2x2x1
jax: 0.10.0
libtpu: 0.0.40
codegen_flags: <defaults>
</compile_context>

<pallas_src>
import functools
import math

import jax
import jax.numpy as jnp
from jax.experimental import pallas as pl
from jax.experimental.pallas import tpu as pltpu


# ---------------------------------------------------------------------------
# helpers
# ---------------------------------------------------------------------------
def _round_up(n, m):
    return ((n + m - 1) // m) * m


def _tile_and_pad(n, cap, multiple=8):
    """Tile size (multiple of `multiple`, <= cap) and padded extent (multiple of tile)."""
    cap = max(multiple, (cap // multiple) * multiple)
    t = _round_up(n, multiple) if n <= cap else cap
    return t, _round_up(n, t)


def _vmem_limit_bytes():
    """Generation-aware VMEM budget: v7x has 64 MiB/TC, v5e/v6e have 128 MiB."""
    cap = 64 * 1024 * 1024
    try:
        cap = int(getattr(pltpu.get_tpu_info(), "vmem_capacity_bytes", cap))
    except Exception:
        pass
    return int(min(cap - 8 * 1024 * 1024, 100 * 1024 * 1024))


# ---------------------------------------------------------------------------
# Stage 1: fused all-head projection kernel
#   grid = (B, num_seq_tiles); one big matmul per tile, outputs written head-major.
# ---------------------------------------------------------------------------
def _proj_kernel(x_ref, w_ref, *o_refs, num_heads, head_dim, compute_dtype):
    x = x_ref[0]                                              # (t, Dx)
    if compute_dtype is not None and x.dtype != compute_dtype:
        x = x.astype(compute_dtype)
    res = jnp.dot(x, w_ref[...], preferred_element_type=jnp.float32)  # (t, n*H*Hd)
    dm = num_heads * head_dim
    for i, o_ref in enumerate(o_refs):
        for h in range(num_heads):                            # store-only static loop
            lo = i * dm + h * head_dim
            o_ref[0, h] = res[:, lo:lo + head_dim].astype(o_ref.dtype)


def _project(x, w_fused, n_out, num_heads, head_dim, seq_tile, out_dtype,
             compute_dtype, vmem_limit):
    B, S, Dx = x.shape
    dm = num_heads * head_dim
    kernel = functools.partial(_proj_kernel, num_heads=num_heads,
                               head_dim=head_dim, compute_dtype=compute_dtype)
    out_shape = [jax.ShapeDtypeStruct((B, num_heads, S, head_dim), out_dtype)
                 for _ in range(n_out)]
    out_specs = [pl.BlockSpec((1, num_heads, seq_tile, head_dim),
                              lambda b, i: (b, 0, i, 0)) for _ in range(n_out)]
    res = pl.pallas_call(
        kernel,
        out_shape=out_shape,
        grid_spec=pltpu.PrefetchScalarGridSpec(
            num_scalar_prefetch=0,
            grid=(B, S // seq_tile),
            in_specs=[
                pl.BlockSpec((1, seq_tile, Dx), lambda b, i: (b, i, 0)),
                # constant-index weight slab: DMA'd once, stays resident
                pl.BlockSpec((Dx, n_out * dm), lambda b, i: (0, 0)),
            ],
            out_specs=out_specs,
        ),
        compiler_params=pltpu.CompilerParams(
            dimension_semantics=("parallel", "parallel"),
            vmem_limit_bytes=vmem_limit,
        ),
    )(x, w_fused)
    return tuple(res)


# ---------------------------------------------------------------------------
# Stage 2: flash attention + fused output projection
#   grid = (B, num_q_tiles, H, num_kv_tiles); kv is the reduction axis, the
#   head axis accumulates into a resident (tq, Dout) output-projection buffer.
# ---------------------------------------------------------------------------
def _flash_attn_kernel(qp_ref, kp_ref, vp_ref, wo_ref, bo_ref,   # inputs
                       o_ref,                                    # output
                       m_scr, l_scr, acc_scr, out_scr,           # VMEM scratch
                       *, kv_valid, kv_tile, approx_recip):
    h = pl.program_id(2)
    ki = pl.program_id(3)
    nh = pl.num_programs(2)
    nk = pl.num_programs(3)

    @pl.when(jnp.logical_and(h == 0, ki == 0))
    def _():
        out_scr[...] = jnp.zeros_like(out_scr)

    @pl.when(ki == 0)
    def _():
        m_scr[...] = jnp.full_like(m_scr, -jnp.inf)
        l_scr[...] = jnp.zeros_like(l_scr)
        acc_scr[...] = jnp.zeros_like(acc_scr)

    q = qp_ref[0, 0]                                          # (tq, Hd), pre-scaled
    k = kp_ref[0, 0]                                          # (tkv, Hd)
    v = vp_ref[0, 0]                                          # (tkv, Hd)

    # contract last dims directly (no explicit K transpose)
    s = jax.lax.dot_general(q, k, (((1,), (1,)), ((), ())),
                            preferred_element_type=jnp.float32)        # (tq, tkv)

    if kv_valid is not None:   # mask padded kv positions (static decision)
        col = ki * kv_tile + jax.lax.broadcasted_iota(jnp.int32, s.shape, 1)
        s = jnp.where(col < kv_valid, s, -jnp.inf)
    # TODO(synk): additive attention_mask path not implemented (module is called with
    # mask=None); adding it needs an all-masked-row guard in the online-softmax update.

    m_prev = m_scr[...]
    m_new = jnp.maximum(m_prev, jnp.max(s, axis=-1, keepdims=True))
    alpha = jnp.exp(m_prev - m_new)
    p = jnp.exp(s - m_new)
    l_scr[...] = alpha * l_scr[...] + jnp.sum(p, axis=-1, keepdims=True)
    acc_scr[...] = alpha * acc_scr[...] + jnp.dot(
        p.astype(v.dtype), v, preferred_element_type=jnp.float32)
    m_scr[...] = m_new

    # per-head finalize at last kv step: normalize + fused output projection (per-head
    # (Hd, Dout) slice of Wo), accumulated into the resident output buffer.
    @pl.when(ki == nk - 1)
    def _():
        inv_l = pl.reciprocal(l_scr[...], approx=approx_recip)     # EUP slot
        attn = acc_scr[...] * inv_l                                # (tq, Hd) f32
        out_scr[...] += jnp.dot(attn.astype(wo_ref.dtype), wo_ref[...],
                                preferred_element_type=jnp.float32)

    @pl.when(jnp.logical_and(h == nh - 1, ki == nk - 1))
    def _():
        o_ref[0] = (out_scr[...] + bo_ref[...].astype(jnp.float32)).astype(o_ref.dtype)


# ---------------------------------------------------------------------------
# Wrapper (the "NormalAttention.forward" equivalent)
# ---------------------------------------------------------------------------
def normal_attention(hidden_states, encoder_hidden_states, wq, wk, wv, wo, bo, *,
                     q_tile=256, kv_tile=256, compute_dtype=jnp.bfloat16):
    """hidden_states: (B, S, D); encoder_hidden_states: (B, Skv, De) or None.
    wq: (H, D, Hd); wk/wv: (H, De, Hd); wo: (H*Hd, Dout); bo: (1, Dout).
    compute_dtype: MXU operand dtype (default bf16; accumulation/softmax stay f32).
    Pass None to keep operands in the input dtype (exact-f32 testing)."""
    is_self = encoder_hidden_states is None
    ctx_in = hidden_states if is_self else encoder_hidden_states

    B, S, D = hidden_states.shape
    _, Skv, De = ctx_in.shape
    H, Dq, Hd = wq.shape
    Dm = H * Hd
    Dout = wo.shape[1]

    assert Dq == D, "wq must be (H, D, Hd) matching hidden_states' model dim"
    assert wk.shape == (H, De, Hd) and wv.shape == (H, De, Hd), \
        "wk/wv must be (H, De, Hd) matching encoder_hidden_states' model dim"
    assert wo.shape[0] == Dm, "wo must be (H*Hd, Dout)"
    assert Hd % 8 == 0 or H == 1, "head_dim must be a multiple of 8 (TPU sublane tiling)"

    cd = None if compute_dtype is None else jnp.dtype(compute_dtype)
    vmem_limit = _vmem_limit_bytes()
    scale = 1.0 / math.sqrt(Hd)

    # ---- tiles + padding (multiples of 8; padded kv positions masked in-kernel) ----
    tq, S_pad = _tile_and_pad(S, q_tile)
    if B == 1 and S_pad // tq < 2:          # keep >=2 parallel grid points (v7x megacore)
        half = tq // 2
        if half >= 8 and half % 8 == 0 and S_pad % half == 0:
            tq = half
    if is_self:
        tkv, Skv_pad = tq, S_pad
    else:
        tkv, Skv_pad = _tile_and_pad(Skv, kv_tile)

    x = hidden_states
    if S_pad != S:
        x = jnp.pad(x, ((0, 0), (0, S_pad - S), (0, 0)))
    ctx = ctx_in
    if (not is_self) and Skv_pad != Skv:
        ctx = jnp.pad(ctx, ((0, 0), (0, Skv_pad - Skv), (0, 0)))

    # ---- fuse per-head weights into lane-dense slabs, fold 1/sqrt(Hd) into Wq,
    #      pre-cast everything to the MXU operand dtype in the wrapper ----
    wq_f = jnp.transpose(wq, (1, 0, 2)).reshape(D, Dm) * scale
    wk_f = jnp.transpose(wk, (1, 0, 2)).reshape(De, Dm)
    wv_f = jnp.transpose(wv, (1, 0, 2)).reshape(De, Dm)
    wo_c = wo
    if cd is not None:
        wq_f = wq_f.astype(cd)
        wk_f = wk_f.astype(cd)
        wv_f = wv_f.astype(cd)
        wo_c = wo_c.astype(cd)
    proj_dtype = cd if cd is not None else hidden_states.dtype

    # ---- stage 1: Q/K/V projections, computed ONCE, head-major (B, H, S, Hd) ----
    if is_self:
        # self-attention: one fused QKV matmul, hidden_states DMA'd once
        wqkv = jnp.concatenate([wq_f, wk_f, wv_f], axis=1)             # (D, 3*Dm)
        qp, kp, vp = _project(x, wqkv, 3, H, Hd, tq, proj_dtype, cd, vmem_limit)
    else:
        (qp,) = _project(x, wq_f, 1, H, Hd, tq, proj_dtype, cd, vmem_limit)
        wkv = jnp.concatenate([wk_f, wv_f], axis=1)                    # (De, 2*Dm)
        kp, vp = _project(ctx, wkv, 2, H, Hd, tkv, proj_dtype, cd, vmem_limit)

    # ---- stage 2: flash attention + fused output projection ----
    nq, nkv = S_pad // tq, Skv_pad // tkv
    kv_valid = Skv if Skv_pad != Skv else None
    approx_recip = (cd is not None) and (cd != jnp.dtype(jnp.float32))

    kernel = functools.partial(_flash_attn_kernel, kv_valid=kv_valid,
                               kv_tile=tkv, approx_recip=approx_recip)

    out = pl.pallas_call(
        kernel,
        out_shape=jax.ShapeDtypeStruct((B, S_pad, Dout), hidden_states.dtype),
        grid_spec=pltpu.PrefetchScalarGridSpec(
            num_scalar_prefetch=0,
            grid=(B, nq, H, nkv),
            in_specs=[
                pl.BlockSpec((1, 1, tq, Hd), lambda b, qi, h, ki: (b, h, qi, 0)),   # Q
                pl.BlockSpec((1, 1, tkv, Hd), lambda b, qi, h, ki: (b, h, ki, 0)),  # K
                pl.BlockSpec((1, 1, tkv, Hd), lambda b, qi, h, ki: (b, h, ki, 0)),  # V
                pl.BlockSpec((Hd, Dout), lambda b, qi, h, ki: (h, 0)),              # Wo[h]
                pl.BlockSpec((1, Dout), lambda b, qi, h, ki: (0, 0)),               # bo
            ],
            out_specs=pl.BlockSpec((1, tq, Dout), lambda b, qi, h, ki: (b, qi, 0)),
            scratch_shapes=[
                pltpu.VMEM((tq, 1), jnp.float32),     # running max (per head)
                pltpu.VMEM((tq, 1), jnp.float32),     # running sum (per head)
                pltpu.VMEM((tq, Hd), jnp.float32),    # un-normalized attn acc (per head)
                pltpu.VMEM((tq, Dout), jnp.float32),  # fused output-projection acc
            ],
        ),
        compiler_params=pltpu.CompilerParams(
            dimension_semantics=("parallel", "parallel", "arbitrary", "arbitrary"),
            vmem_limit_bytes=vmem_limit,
        ),
    )(qp, kp, vp, wo_c, bo)

    if S_pad != S:
        out = out[:, :S, :]
    # NormalAttention also keeps `self.history = out.detach()`; host-side bookkeeping.
    return out


# ---------------------------------------------------------------------------
# Pure-JAX reference for correctness checking
# ---------------------------------------------------------------------------
def _reference(hidden, enc, wq, wk, wv, wo, bo):
    if enc is None:
        enc = hidden
    H, D, Hd = wq.shape
    scale = 1.0 / math.sqrt(Hd)
    q = jnp.einsum("bsd,hde->bhse", hidden, wq)
    k = jnp.einsum("bsd,hde->bhse", enc, wk)
    v = jnp.einsum("bsd,hde->bhse", enc, wv)
    s = jnp.einsum("bhqe,bhke->bhqk", q, k) * scale
    p = jax.nn.softmax(s, axis=-1)
    o = jnp.einsum("bhqk,bhke->bhqe", p, v)
    o = jnp.transpose(o, (0, 2, 1, 3)).reshape(hidden.shape[0], hidden.shape[1], H * Hd)
    return o @ wo + bo


if __name__ == "__main__":
    B, S, Skv, D, H = 2, 8, 8, 32, 4
    Hd = D // H

    key = jax.random.PRNGKey(0)
    k_hs, k_enc, k_wq, k_wk, k_wv, k_wo, k_bo = jax.random.split(key, 7)

    hidden = jax.random.normal(k_hs, (B, S, D), dtype=jnp.float32)
    encoder = jax.random.normal(k_enc, (B, Skv, D), dtype=jnp.float32)

    init = 0.02
    wq = init * jax.random.normal(k_wq, (H, D, Hd), dtype=jnp.float32)
    wk = init * jax.random.normal(k_wk, (H, D, Hd), dtype=jnp.float32)
    wv = init * jax.random.normal(k_wv, (H, D, Hd), dtype=jnp.float32)
    wo = init * jax.random.normal(k_wo, (D, D), dtype=jnp.float32)
    bo = init * jax.random.normal(k_bo, (1, D), dtype=jnp.float32)

    # 1) cross-attention, exact-f32 MXU operands (tight check)
    out = jax.block_until_ready(
        normal_attention(hidden, encoder, wq, wk, wv, wo, bo, compute_dtype=None))
    ref = _reference(hidden, encoder, wq, wk, wv, wo, bo)
    assert out.shape == (B, S, D)
    assert jnp.allclose(out, ref, atol=2e-5, rtol=2e-5), "mismatch (cross, f32)"

    # 2) self-attention path (encoder_hidden_states=None), exact-f32 operands
    out_self = jax.block_until_ready(
        normal_attention(hidden, None, wq, wk, wv, wo, bo, compute_dtype=None))
    ref_self = _reference(hidden, None, wq, wk, wv, wo, bo)
    assert jnp.allclose(out_self, ref_self, atol=2e-5, rtol=2e-5), "mismatch (self, f32)"

    # 3) production default: bf16 MXU operands, f32 accumulation / softmax
    out_bf = jax.block_until_ready(
        normal_attention(hidden, encoder, wq, wk, wv, wo, bo))
    assert jnp.allclose(out_bf, ref, atol=5e-3, rtol=5e-2), "mismatch (cross, bf16)"

    # 4) ragged sequence lengths exercise the pad + in-kernel kv-mask path
    S2, Skv2 = 10, 12
    hidden2 = jax.random.normal(k_hs, (B, S2, D), dtype=jnp.float32)
    encoder2 = jax.random.normal(k_enc, (B, Skv2, D), dtype=jnp.float32)
    out2 = jax.block_until_ready(
        normal_attention(hidden2, encoder2, wq, wk, wv, wo, bo, compute_dtype=None))
    ref2 = _reference(hidden2, encoder2, wq, wk, wv, wo, bo)
    assert out2.shape == (B, S2, D)
    assert jnp.allclose(out2, ref2, atol=2e-5, rtol=2e-5), "mismatch (cross, padded)"

    print("KERNEL_OK")
</pallas_src>

<mosaic_0001>
module attributes {stable_mosaic.version = 11 : i64} {
  func.func @_proj_kernel(%arg0: i32, %arg1: i32, %arg2: memref<1x8x32xf32, #tpu.memory_space<vmem>>, %arg3: memref<32x32xf32, #tpu.memory_space<vmem>>, %arg4: memref<1x4x8x8xf32, #tpu.memory_space<vmem>>) attributes {dimension_semantics = [#tpu.dimension_semantics<parallel>, #tpu.dimension_semantics<parallel>], iteration_bounds = array<i64: 2, 1>, scalar_prefetch = 0 : i64, scratch_operands = 0 : i64, tpu.core_type = #tpu.core_type<tc>, window_params = [{transform_indices = @transform_0, window_bounds = array<i64: 1, 8, 32>}, {pipeline_mode = #tpu.pipeline_mode<synchronous>, transform_indices = @transform_1, window_bounds = array<i64: 32, 32>}, {transform_indices = @transform_2, window_bounds = array<i64: 1, 4, 8, 8>}]} {
    %c0 = arith.constant 0 : index
    %c0_0 = arith.constant 0 : index
    %c0_1 = arith.constant 0 : index
    %0 = vector.load %arg2[%c0, %c0_0, %c0_1] : memref<1x8x32xf32, #tpu.memory_space<vmem>>, vector<1x8x32xf32>
    %1 = vector.shape_cast %0 : vector<1x8x32xf32> to vector<8x32xf32>
    %c0_2 = arith.constant 0 : index
    %c0_3 = arith.constant 0 : index
    %2 = vector.load %arg3[%c0_2, %c0_3] : memref<32x32xf32, #tpu.memory_space<vmem>>, vector<32x32xf32>
    %cst = arith.constant dense<0.000000e+00> : vector<8x32xf32>
    %3 = tpu.matmul %1, %2, %cst {dimension_numbers = #tpu.dot_dimension_numbers<[1], [0], [0], [1], [0, 0, 1, 1], [], []>} : vector<8x32xf32>, vector<32x32xf32>, vector<8x32xf32> -> vector<8x32xf32>
    %4 = vector.extract_strided_slice %3 {offsets = [0, 0], sizes = [8, 8], strides = [1, 1]} : vector<8x32xf32> to vector<8x8xf32>
    %c0_4 = arith.constant 0 : index
    %c0_5 = arith.constant 0 : index
    %c0_6 = arith.constant 0 : index
    %c0_7 = arith.constant 0 : index
    %5 = vector.load %arg4[%c0_4, %c0_5, %c0_6, %c0_7] : memref<1x4x8x8xf32, #tpu.memory_space<vmem>>, vector<1x1x8x8xf32>
    %6 = vector.shape_cast %5 : vector<1x1x8x8xf32> to vector<8x8xf32>
    %7 = vector.shape_cast %4 : vector<8x8xf32> to vector<1x1x8x8xf32>
    tpu.vector_store %arg4[%c0_4, %c0_5, %c0_6, %c0_7], %7 {strides = array<i32>} : memref<1x4x8x8xf32, #tpu.memory_space<vmem>>, vector<1x1x8x8xf32>,
    %8 = vector.extract_strided_slice %3 {offsets = [0, 8], sizes = [8, 8], strides = [1, 1]} : vector<8x32xf32> to vector<8x8xf32>
    %c0_8 = arith.constant 0 : index
    %c1 = arith.constant 1 : index
    %c0_9 = arith.constant 0 : index
    %c0_10 = arith.constant 0 : index
    %9 = vector.load %arg4[%c0_8, %c1, %c0_9, %c0_10] : memref<1x4x8x8xf32, #tpu.memory_space<vmem>>, vector<1x1x8x8xf32>
    %10 = vector.shape_cast %9 : vector<1x1x8x8xf32> to vector<8x8xf32>
    %11 = vector.shape_cast %8 : vector<8x8xf32> to vector<1x1x8x8xf32>
    tpu.vector_store %arg4[%c0_8, %c1, %c0_9, %c0_10], %11 {strides = array<i32>} : memref<1x4x8x8xf32, #tpu.memory_space<vmem>>, vector<1x1x8x8xf32>,
    %12 = vector.extract_strided_slice %3 {offsets = [0, 16], sizes = [8, 8], strides = [1, 1]} : vector<8x32xf32> to vector<8x8xf32>
    %c0_11 = arith.constant 0 : index
    %c2 = arith.constant 2 : index
    %c0_12 = arith.constant 0 : index
    %c0_13 = arith.constant 0 : index
    %13 = vector.load %arg4[%c0_11, %c2, %c0_12, %c0_13] : memref<1x4x8x8xf32, #tpu.memory_space<vmem>>, vector<1x1x8x8xf32>
    %14 = vector.shape_cast %13 : vector<1x1x8x8xf32> to vector<8x8xf32>
    %15 = vector.shape_cast %12 : vector<8x8xf32> to vector<1x1x8x8xf32>
    tpu.vector_store %arg4[%c0_11, %c2, %c0_12, %c0_13], %15 {strides = array<i32>} : memref<1x4x8x8xf32, #tpu.memory_space<vmem>>, vector<1x1x8x8xf32>,
    %16 = vector.extract_strided_slice %3 {offsets = [0, 24], sizes = [8, 8], strides = [1, 1]} : vector<8x32xf32> to vector<8x8xf32>
    %c0_14 = arith.constant 0 : index
    %c3 = arith.constant 3 : index
    %c0_15 = arith.constant 0 : index
    %c0_16 = arith.constant 0 : index
    %17 = vector.load %arg4[%c0_14, %c3, %c0_15, %c0_16] : memref<1x4x8x8xf32, #tpu.memory_space<vmem>>, vector<1x1x8x8xf32>
    %18 = vector.shape_cast %17 : vector<1x1x8x8xf32> to vector<8x8xf32>
    %19 = vector.shape_cast %16 : vector<8x8xf32> to vector<1x1x8x8xf32>
    tpu.vector_store %arg4[%c0_14, %c3, %c0_15, %c0_16], %19 {strides = array<i32>} : memref<1x4x8x8xf32, #tpu.memory_space<vmem>>, vector<1x1x8x8xf32>,
    return
  }
  func.func @transform_0(%arg0: i32, %arg1: i32) -> (i32, i32, i32) {
    %c0_i32 = arith.constant 0 : i32
    %c0_i32_0 = arith.constant 0 : i32
    return %arg0, %arg1, %c0_i32 : i32, i32, i32
  }
  func.func @transform_1(%arg0: i32, %arg1: i32) -> (i32, i32) {
    %c0_i32 = arith.constant 0 : i32
    %c0_i32_0 = arith.constant 0 : i32
    %c0_i32_1 = arith.constant 0 : i32
    return %c0_i32, %c0_i32_0 : i32, i32
  }
  func.func @transform_2(%arg0: i32, %arg1: i32) -> (i32, i32, i32, i32) {
    %c0_i32 = arith.constant 0 : i32
    %c0_i32_0 = arith.constant 0 : i32
    %c0_i32_1 = arith.constant 0 : i32
    return %arg0, %c0_i32, %arg1, %c0_i32_0 : i32, i32, i32, i32
  }
}

</mosaic_0001>

<bundles_post_ra>
// kernel: tpu_custom_call.1
= control target key start
LH: loop header
LB: loop body
LE: loop exit
PB: predicated region body
PF: predicated region fallthrough
CT: control target
= control target key end

     0   :  { %7 = vsyncpa [#allocation3], 0  ;;  %s918_s0 = inlined_call_operand.hbm [shape: f32[2,8,32], index: 0, kind: input, shape index: {}]   ;;  %s919_s1 = inlined_call_operand.hbm [shape: f32[32,32], index: 1, kind: input, shape index: {}]   ;;  %s920_s2 = inlined_call_operand.hbm [shape: f32[2,4,8,8], index: 2, kind: output, shape index: {}]  }
   0x1   :  { %9 = vsyncpa [#allocation3 + $0x1], 0 }
   0x2   :  { %10 = vsyncpa [#allocation6], 0 }
   0x3   :  { %11 = vsyncpa [#allocation4], 0 }
   0x4   :  { %13 = vsyncpa [#allocation4 + $0x1], 0  ;;  %s697_s9 = smov 0   ;;  %s699_s10 = smov 0  }
   0x5   :  { %s701_s11 = smov 0   ;;  %s703_s12 = smov 0  }
   0x6   :  { %s705_s13 = smov 0   ;;  %s707_s14 = smov 0  }
   0x7 LB: > { %s397_s15 = sadd.s32 4294967295, %s667_s14   ;;  %s398_s16 = sadd.s32 4294967294, %s667_s14   ;;  %s667_s14 = sphi %s707_s14, %s19_s14   ;;  %s663_s13 = sphi %s705_s13, %s944_s13   ;;  %s659_s12 = sphi %s703_s12, %s943_s12   ;;  %s655_s11 = sphi %s701_s11, %s942_s11   ;;  %s651_s10 = sphi %s699_s10, %s941_s10   ;;  %s647_s9 = sphi %s697_s9, %s940_s9  }
   0x8   : > { %p53_p0 = scmp.ne.s32.totalorder %s651_s10, %s647_s9  ;;  %p731_p1 = scmp.eq.s32.totalorder %s397_s15, 0 }
   0x9   : > { %p735_p2 = scmp.eq.s32.totalorder %s397_s15, 1  ;;  %p106_p3 = scmp.eq.s32.totalorder %s398_s16, 1 }
   0xa   : > { %s925_s17 = scalar_select %p731_p1, 1, 0 }
   0xb   : > { %s926_s18 = scalar_select %p735_p2, 1, 0 }
   0xc   : > { %p741_p4 = por %p731_p1, %p53_p0  ;;  %p399_p5 = scmp.ge.s32.totalorder %s667_s14, 1 }
   0xd   : > { %p746_p6 = por %p106_p3, %p53_p0  ;;  %p113_p7 = scmp.lt.s32.totalorder %s667_s14, 3 }
   0xe   : > { %s927_s19 = scalar_select %p741_p4, 1, 0 }
   0xf   : > { %s928_s20 = scalar_select %p746_p6, 1, 0 }
  0x10   : > { %p751_p8 = pnand %p399_p5, %p113_p7  ;;  %s669_s22 = smov [#allocation5]  }
  0x11   : > { %s125_s23 = sshll.u32 %s669_s22, 4  ;;  %s31_s25 = sadd.s32 1, %s663_s13  ;;  %s126_s23 = int_to_ptr.vmem [resolvable:$true] %s125_s23 }
  0x12   : > { %s929_s21 = scalar_select %p751_p8, 1, 0 }
  0x13   : > { %p448_p9 = pneg %p751_p8  ;;  %s523_s28 = scalar_lea.hbm %s919_s1, 512 }
  0x14   : > { %p524_p12 = scmp.ne.s32.totalorder %s919_s1, %s523_s28  ;;  %p530_p5 = scmp.lt.u32.totalorder %s523_s28, %s919_s1 }
  0x15   : > { %p760_p11 = pnand %p448_p9, %p731_p1 }
  0x17   : > { %p525_p13 = pneg %p760_p11 }
  0x19   : > { %p526_p0 = pnand %p525_p13, %p524_p12 }
  0x1b   : > { %p527_p3 = pneg %p526_p0 }
  0x1d   : > { %p532_p7 = pnand %p530_p5, %p527_p3 }
  0x1f   : > { %535 = shalt.err (!%p532_p7)
}
  0x20   : > { %s536_s5 = scalar_lea.vmem %s126_s23, 512  ;;  %p544_p1 = scmp.lt.s32.totalorder %s126_s23, %s126_s23 }
  0x21   : > { %p537_p9 = scmp.ne.s32.totalorder %s126_s23, %s536_s5  ;;  %p545_p4 = scmp.lt.s32.totalorder %s536_s5, %s536_s5 }
  0x23   : > { %p539_p10 = pnand %p537_p9, %p525_p13  ;;  %p546_p8 = por %p545_p4, %p544_p1 }
  0x25   : > { %p540_p6 = pneg %p539_p10 }
  0x27   : > { %p547_p2 = pnand %p546_p8, %p540_p6 }
  0x29   : > { %550 = shalt.err (!%p547_p2)
}
  0x2a   : > { %s670_s6 = smov 128   ;;  %s671_s7 = smov 8  }
  0x2b   : > { %451 = dma.hbm_to_vmem [thread:$0]  (!%p760_p11), %s919_s1, 512, %s126_s23, [#allocation6], %s670_s6, %s670_s6, %s671_s7  }
  0x2c   : > { %p33_p1 = scmp.ge.s32.totalorder %s31_s25, 2  ;;  %s40_s16 = sadd.s32 1, %s655_s11 }
  0x2d   : > { %p47_p2 = scmp.ne.s32.totalorder %s655_s11, %s651_s10  ;;  %p48_p4 = scmp.eq.s32.totalorder %s667_s14, 0 }
  0x2e   : > { %s946_s25 = smov (%p33_p1, %s31_s25), 0  ;;  %p932_p8 = scmp.ne.s32.totalorder %s926_s18, 0 }
  0x2f   : > { %p787_p6 = por %p48_p4, %p47_p2  ;;  %s35_s24 = ssub.s32 %s663_s13, %s946_s25 }
  0x30   : > { %p793_p10 = por %p932_p8, %p47_p2  ;;  %p461_p12 = scmp.lt.s32.totalorder %s667_s14, 2 }
  0x31   : > { %p38_p11 = scmp.eq.s32.totalorder %s35_s24, 0  ;;  %s139_s23 = sand.u32 1, %s655_s11  }
  0x32   : > { %s402_s27 = sshll.u32 %s139_s23, 3  ;;  %s403_s29 = sshll.u32 %s663_s13, 7 }
  0x33   : > { %s802_s28 = scalar_select %p38_p11, %s655_s11, %s40_s16  }
  0x34   : > { %s808_s4 = scalar_lea.hbm %s918_s0, %s403_s29  ;;  %s143_s18 = scalar_lea.vmem [#allocation2], %s402_s27 }
  0x35   : > { %s151_s5 = sshll.u32 %s143_s18, 4  ;;  %p814_p13 = pnand %p461_p12, %p787_p6  ;;  %s810_s5 = int_to_ptr.vmem [resolvable:$true] %s151_s5 }
  0x36   : > { %s140_s7 = scalar_lea.sflag [#allocation3], %s139_s23  ;;  %s551_s8 = scalar_lea.hbm %s808_s4, 128 }
  0x37   : > { %p552_p0 = scmp.ne.s32.totalorder %s808_s4, %s551_s8  ;;  %p553_p3 = pneg %p814_p13 }
  0x38   : > { %s556_s24 = scalar_lea.hbm %s918_s0, 256  ;;  %p557_p9 = scmp.lt.u32.totalorder %s808_s4, %s918_s0 }
  0x39   : > { %p554_p5 = pnand %p553_p3, %p552_p0  ;;  %p558_p1 = scmp.lt.u32.totalorder %s556_s24, %s551_s8 }
  0x3a   : > { %p560_p4 = scmp.lt.u32.totalorder %s551_s8, %s808_s4 }
  0x3b   : > { %p555_p7 = pneg %p554_p5  ;;  %p559_p2 = por %p558_p1, %p557_p9 }
  0x3d   : > { %p561_p6 = por %p560_p4, %p559_p2 }
  0x3f   : > { %p562_p8 = pnand %p561_p6, %p555_p7 }
  0x41   : > { %565 = shalt.err (!%p562_p8)
}
  0x42   : > { %s566_s23 = scalar_lea.vmem %s810_s5, 128  ;;  %s672_s29 = smov [#allocation2]  }
  0x43   : > { %p567_p12 = scmp.ne.s32.totalorder %s810_s5, %s566_s23  ;;  %s571_s30 = sshll.u32 %s672_s29, 4  ;;  %s572_s30 = int_to_ptr.vmem [resolvable:$false] %s571_s30 }
  0x44   : > { %s573_s3 = scalar_lea.vmem %s572_s30, 256  ;;  %p574_p5 = scmp.lt.s32.totalorder %s810_s5, %s572_s30 }
  0x45   : > { %p569_p11 = pnand %p567_p12, %p553_p3  ;;  %p575_p9 = scmp.lt.s32.totalorder %s573_s3, %s566_s23 }
  0x47   : > { %p570_p0 = pneg %p569_p11  ;;  %p576_p1 = por %p575_p9, %p574_p5 }
  0x49   : > { %p577_p2 = pnand %p576_p1, %p570_p0 }
  0x4b   : > { %580 = shalt.err (!%p577_p2)
}
  0x4c   : > { %455 = dma.hbm_to_vmem [thread:$0]  (!%p814_p13), %s808_s4, 128, %s810_s5, %s140_s7  }
  0x4d   : > { %p935_p7 = scmp.ne.s32.totalorder %s929_s21, 0 }
  0x4e   : > { %s846_s18 = sand.u32 (!%p935_p7), 1, %s651_s10   ;;  %p936_p3 = scmp.ne.s32.totalorder (!%p935_p7), %s927_s19, 0 }
  0x4f   : > { %160 = sbr.rel (%p935_p7) target bundleno = 447 (0x1bf), region = 28  ;;  %s405_s8 = sshll.u32 (!%p935_p7), %s846_s18, 3 }
  0x50   : > { %s163_s15 = scalar_lea.sflag (!%p935_p7), [#allocation3], %s846_s18  ;;  %s166_s16 = scalar_lea.vmem (!%p935_p7), [#allocation2], %s405_s8 }
  0x56   : > { %634 = dma.done.wait (%p936_p3), %s163_s15, 128  }
  0x57   : > { %636 = vsyncadd (%p936_p3), %s163_s15, 4294967168  ;;  %p937_p4 = scmp.ne.s32.totalorder %s925_s17, 0 }
  0x59   : > { %638 = dma.done.wait (%p937_p4), [#allocation6], 512  }
  0x5a   : > { %640 = vsyncadd (%p937_p4), [#allocation6], 4294966784  ;;  %v673_v0 = vmov 0.0|0.0   ;;  %vm674_vm0 = vmmov 0   ;;  %v675_v1 = vmov 0.0   ;;  %v192_v2 = vld [vmem:[#allocation5] sm:$0xff] }
  0x5b   : > { %434 = vmatprep.subr.bf16.mxu0 %v673_v0  ;;  %431 = vmatprep.mubr.msk.f32.mxu0 %vm674_vm0, %v675_v1  ;;  %v193_v3 = vld [vmem:[#allocation5 + $0x8] sm:$0xff]  ;;  %v194_v4 = vld [vmem:[#allocation5 + $0x10] sm:$0xff]  ;;  %v195_v6 = vld [vmem:[#allocation5 + $0x18] sm:$0xff]  ;;  %vm196_vm1 = vcmask 261120   ;;  %s407_s17 = sshll.u32 %s846_s18, 5  ;;  %vm270_vm2 = vcmask 64512  }
  0x5c   : > { %v435_v5 = vpack.c.bf16 %v193_v3, %v192_v2  ;;  %v438_v7 = vpack.c.bf16 %v195_v6, %v194_v4  ;;  %v191_v8 = vld [vmem:[%s166_s16] sm:$0xff]  ;;  %s190_s19 = scalar_lea.vmem [#allocation7], %s407_s17  ;;  %s676_s21 = smov 104  }
  0x5d   : > { %s677_s4 = smov 120   ;;  %s678_s5 = smov 112  }
  0x5e   : > { %436 = vmatpush3.bf16.msra.mxu0 %v435_v5  ;;  %s303_s6 = sshll.u32 %s190_s19, 4  ;;  %s417_s7 = sshll.u32 %s659_s12, 9  ;;  %s861_s6 = int_to_ptr.vmem [resolvable:$true] %s303_s6 }
  0x5f   : > { %437 = vmatprep.subr.bf16.mxu0 %v673_v0  ;;  %s868_s27 = scalar_lea.hbm %s920_s2, %s417_s7  ;;  %s289_s12 = scalar_lea.sflag [#allocation4], %s846_s18 }
  0x60   : > { %s581_s23 = scalar_lea.vmem %s861_s6, 512  ;;  %s679_s29 = smov [#allocation7]  }
  0x61   : > { %p582_p13 = scmp.ne.s32.totalorder %s861_s6, %s581_s23  ;;  %s585_s30 = sshll.u32 %s679_s29, 4  ;;  %s586_s30 = int_to_ptr.vmem [resolvable:$false] %s585_s30 }
  0x62   : > { %439 = vmatpush3.bf16.msra.mxu0 %v438_v7  ;;  %s587_s3 = scalar_lea.vmem %s586_s30, 1024  ;;  %p588_p12 = scmp.lt.s32.totalorder %s861_s6, %s586_s30 }
  0x63   : > { %p583_p6 = pnand %p582_p13, %p793_p10  ;;  %p589_p11 = scmp.lt.s32.totalorder %s587_s3, %s581_s23 }
  0x65   : > { %432 = vmatmul.mubr.msk.f32.vlgmr.msra.gmra.mrb[0].mxu0 %vm196_vm1, %v191_v8  ;;  %p584_p8 = pneg %p583_p6  ;;  %p590_p0 = por %p589_p11, %p588_p12 }
  0x67   : > { %p591_p5 = pnand %p590_p0, %p584_p8 }
 0x138   : > { %v266_v9 = vpop.f32.mrb[0].mxu0 }
 0x139   : > { %271 = vst.msk [vmem:[%s190_s19] sm:$0xff] %vm270_vm2, %v266_v9  ;;  %283 = vrot.lane.b32.xlu1 %v266_v9, %s676_s21  ;;  %273 = vrot.lane.b32.xlu0 %v266_v9, %s677_s4  ;;  %v433_v10 = vpop.f32.mrb[1].mxu0 }
 0x13d   : > { %278 = vrot.lane.b32.xlu0 %v266_v9, %s678_s5 }
 0x1ab   : > { %v284_v11 = vpop.permute.xlu1 %283  ;;  %v274_v12 = vpop.permute.xlu0 %273 }
 0x1ac   : > { %411 = vst.msk [vmem:[%s190_s19 + $0x18] sm:$0xff] %vm270_vm2, %v284_v11  ;;  %409 = vst.msk [vmem:[%s190_s19 + $0x8] sm:$0xff] %vm270_vm2, %v274_v12 }
 0x1af   : > { %v279_v13 = vpop.permute.xlu0 %278 }
 0x1b0   : > { %410 = vst.msk [vmem:[%s190_s19 + $0x10] sm:$0xff] %vm270_vm2, %v279_v13 }
 0x1b1   : > { %594 = shalt.err (!%p591_p5)
}
 0x1b2   : > { %s595_s8 = scalar_lea.hbm %s868_s27, 512  ;;  %s599_s17 = scalar_lea.hbm %s920_s2, 1024 }
 0x1b3   : > { %p596_p9 = scmp.ne.s32.totalorder %s868_s27, %s595_s8  ;;  %p600_p7 = scmp.lt.u32.totalorder %s868_s27, %s920_s2 }
 0x1b4   : > { %p601_p3 = scmp.lt.u32.totalorder %s599_s17, %s595_s8  ;;  %p603_p13 = scmp.lt.u32.totalorder %s595_s8, %s868_s27 }
 0x1b5   : > { %p597_p1 = pnand %p596_p9, %p793_p10 }
 0x1b6   : > { %p602_p4 = por %p601_p3, %p600_p7 }
 0x1b7   : > { %p598_p2 = pneg %p597_p1 }
 0x1b8   : > { %p604_p6 = por %p603_p13, %p602_p4 }
 0x1ba   : > { %p605_p8 = pnand %p604_p6, %p598_p2 }
 0x1bc   : > { %608 = shalt.err (!%p605_p8)
}
 0x1bd   : > { %s680_s4 = smov 128   ;;  %s681_s5 = smov 8  }
 0x1be   : > { %446 = dma.vmem_to_hbm [thread:$0]  (%p793_p10), %s861_s6, 512, %s868_s27, %s289_s12, %s680_s4, %s680_s4, %s681_s5  }
 0x1bf PF: > { %s318_s7 = sand.u32 1, %s647_s9   ;;  %p938_p12 = scmp.ne.s32.totalorder %s928_s20, 0 }
 0x1c0   : > { %p939_p11 = scmp.ge.s32.totalorder %s667_s14, 2  ;;  %s319_s24 = scalar_lea.sflag [#allocation4], %s318_s7 }
 0x1c2   : > { %p457_p0 = pnand %p939_p11, %p938_p12 }
 0x1c4   : > { %642 = dma.done.wait (!%p457_p0), %s319_s24, 512  }
 0x1c5   : > { %644 = vsyncadd (!%p457_p0), %s319_s24, 4294966784  ;;  %s19_s14 = sadd.s32 1, %s667_s14   ;;  %s940_s9 = smov %s651_s10 }
 0x1c6   : > { %p16_p5 = scmp.ge.s32.totalorder %s19_s14, 4   ;;  %s941_s10 = smov %s655_s11 }
 0x1c7   : > { %s942_s11 = smov %s802_s28  ;;  %s943_s12 = smov %s663_s13 }
 0x1c8   : > { %s944_s13 = smov %s946_s25  ;;  %18 = sbr.rel (!%p16_p5) target bundleno = 7 (0x7), region = 80 }
 0x1cf   :  { %324 = vsyncpa [#allocation3], 1 }
 0x1d0   :  { %326 = vsyncpa [#allocation3 + $0x1], 1 }
 0x1d1   :  { %327 = vsyncpa [#allocation6], 1 }
 0x1d2   :  { %328 = vsyncpa [#allocation4], 1 }
 0x1d3   :  { %330 = vsyncpa [#allocation4 + $0x1], 1 }

</bundles_post_ra>
